<compile_context>
chip_gen: v7x
topology: tpu7x:2x2x1
jax: 0.10.0
libtpu: 0.0.40
codegen_flags: <defaults>
</compile_context>

<pallas_src>
import math
import jax
import jax.numpy as jnp
from jax.experimental import pallas as pl
from jax.experimental.pallas import tpu as pltpu


def _sine_matmul_kernel(x_ref, wt_ref, b_ref, o_ref):
    # x_ref : (n_blk, C_in, t_hw)   pixel block(s), channels-major
    # wt_ref: (C_out, C_in)         = (omega_0 * W)^T, resident across grid
    # b_ref : (C_out, 1)            = omega_0 * b
    # o_ref : (n_blk, C_out, t_hw)  lane-dense output block(s)
    w = wt_ref[...]
    b = b_ref[...]
    # n_blk is a small static block dim (<= 16): unrolled loop of
    # (C_out, C_in) @ (C_in, t_hw) matmuls keeps data in its native layout
    # (no in-VMEM transposes).
    for n in range(x_ref.shape[0]):
        y = jnp.dot(w, x_ref[n], preferred_element_type=jnp.float32) + b
        o_ref[n] = jnp.sin(y).astype(o_ref.dtype)


def sine_linear_layer(x_nchw, weight, bias, omega_0=30.0, *,
                      out_dtype=None,
                      pixels_per_step_target=65536,
                      tile_vmem_budget_bytes=12 * 1024 * 1024):
    """SIREN layer: sin(omega_0 * (1x1_conv(x) + b)).

    x_nchw: (N, C_in, H, W); weight: (C_in, C_out); bias: (C_out,).
    out_dtype: optional narrower store dtype (e.g. jnp.bfloat16); the sin
    itself is always evaluated in f32.
    """
    N, C_in, H, W = x_nchw.shape
    C_out = weight.shape[1]
    hw = H * W
    out_dtype = x_nchw.dtype if out_dtype is None else out_dtype
    in_bytes = jnp.dtype(x_nchw.dtype).itemsize
    out_bytes = jnp.dtype(out_dtype).itemsize

    # Pixels per grid step: big enough to amortize the ~0.35us/step overhead,
    # capped so the double-buffered in+out blocks fit the VMEM budget.
    bytes_per_px = 2 * (C_in * in_bytes + C_out * out_bytes)
    px_target = max(128, min(pixels_per_step_target,
                             tile_vmem_budget_bytes // bytes_per_px))

    if hw <= px_target:
        # Small images: whole pixel axis per block, several images per step.
        t_hw = hw                                     # full dim -> no (8,128) issue
        n_blk = int(min(N, max(1, px_target // hw), 16))
        while N % n_blk:                              # exact batch grid (no ragged N)
            n_blk -= 1
    else:
        # Large images: one image per step, big lane-dense pixel tiles.
        # The last pixel block may be ragged: OOB reads only feed output
        # columns that are dropped on writeback (op is pointwise in pixels).
        t_hw = max(128, (px_target // 128) * 128)
        n_blk = 1

    # v7x has 2 TensorCores: avoid collapsing the whole problem into 1 step.
    if (N // n_blk) * pl.cdiv(hw, t_hw) < 2:
        if n_blk > 1:
            n_blk //= 2
            while N % n_blk:
                n_blk -= 1
        elif hw >= 256:
            t_hw = pl.cdiv(hw, 2 * 128) * 128         # ~half, multiple of 128

    grid = (N // n_blk, pl.cdiv(hw, t_hw))

    # Free (contiguous) reshape; no pad, no slice -> no extra HBM passes.
    x_r = x_nchw.reshape(N, C_in, hw)

    # Fold omega_0 into the tiny parameters (wrapper-side, effectively free).
    wt = (omega_0 * weight).T.astype(x_nchw.dtype)            # (C_out, C_in)
    b2 = (omega_0 * bias).reshape(C_out, 1).astype(jnp.float32)

    cost = pl.CostEstimate(
        flops=2 * N * C_in * C_out * hw,
        transcendentals=N * C_out * hw,
        bytes_accessed=(N * C_in * hw * in_bytes
                        + N * C_out * hw * out_bytes
                        + (C_in * C_out + C_out) * 4),
    )

    out_r = pl.pallas_call(
        _sine_matmul_kernel,
        out_shape=jax.ShapeDtypeStruct((N, C_out, hw), out_dtype),
        grid_spec=pltpu.PrefetchScalarGridSpec(
            num_scalar_prefetch=0,
            grid=grid,
            in_specs=[
                pl.BlockSpec((n_blk, C_in, t_hw), lambda i, j: (i, 0, j)),
                pl.BlockSpec((C_out, C_in), lambda i, j: (0, 0)),
                pl.BlockSpec((C_out, 1), lambda i, j: (0, 0)),
            ],
            out_specs=pl.BlockSpec((n_blk, C_out, t_hw), lambda i, j: (i, 0, j)),
        ),
        compiler_params=pltpu.CompilerParams(
            dimension_semantics=("parallel", "parallel"),
            vmem_limit_bytes=32 * 1024 * 1024),
        cost_estimate=cost,
    )(x_r, wt, b2)

    return out_r.reshape(N, C_out, H, W)


def init_params(key, in_channels, out_channels, is_first, omega_0):
    """Deterministic init matching the SIREN module's scheme (Conv2d 1x1
    weight stored as (in, out) for the matmul; bias (out,))."""
    kw, kb = jax.random.split(key)
    if is_first:
        bound_w = 1.0 / in_channels
    else:
        bound_w = math.sqrt(6.0 / in_channels) / omega_0
    weight = jax.random.uniform(
        kw, (in_channels, out_channels), jnp.float32, -bound_w, bound_w)
    # PyTorch Conv2d default bias init: U(-1/sqrt(fan_in), 1/sqrt(fan_in))
    bound_b = 1.0 / math.sqrt(in_channels)
    bias = jax.random.uniform(
        kb, (out_channels,), jnp.float32, -bound_b, bound_b)
    return weight, bias


if __name__ == "__main__":
    key = jax.random.PRNGKey(0)
    k_x, k_p = jax.random.split(key)

    # Small shapes consistent with the module's forward (NCHW conv input).
    N, C_in, H, W = 2, 4, 16, 16
    C_out = 8
    omega_0 = 30.0
    is_first = True

    x = jax.random.normal(k_x, (N, C_in, H, W), dtype=jnp.float32)
    weight, bias = init_params(k_p, C_in, C_out, is_first, omega_0)

    out = sine_linear_layer(x, weight, bias, omega_0=omega_0)
    out = jax.block_until_ready(out)

    # Reference check in plain JAX (1x1 conv == channel matmul).
    ref = jnp.sin(
        omega_0 * (jnp.einsum("nchw,co->nohw", x, weight) +
                   bias.reshape(1, C_out, 1, 1)))
    assert out.shape == (N, C_out, H, W)
    assert jnp.allclose(out, ref, atol=1e-4, rtol=1e-4)

    print("KERNEL_OK")
</pallas_src>

<mosaic_0001>
module attributes {stable_mosaic.version = 11 : i64} {
  func.func @_sine_matmul_kernel(%arg0: i32, %arg1: i32, %arg2: memref<1x4x256xf32, #tpu.memory_space<vmem>>, %arg3: memref<8x4xf32, #tpu.memory_space<vmem>>, %arg4: memref<8x1xf32, #tpu.memory_space<vmem>>, %arg5: memref<1x8x256xf32, #tpu.memory_space<vmem>>) attributes {dimension_semantics = [#tpu.dimension_semantics<parallel>, #tpu.dimension_semantics<parallel>], iteration_bounds = array<i64: 2, 1>, scalar_prefetch = 0 : i64, scratch_operands = 0 : i64, tpu.core_type = #tpu.core_type<tc>, window_params = [{transform_indices = @transform_0, window_bounds = array<i64: 1, 4, 256>}, {pipeline_mode = #tpu.pipeline_mode<synchronous>, transform_indices = @transform_1, window_bounds = array<i64: 8, 4>}, {pipeline_mode = #tpu.pipeline_mode<synchronous>, transform_indices = @transform_2, window_bounds = array<i64: 8, 1>}, {transform_indices = @transform_3, window_bounds = array<i64: 1, 8, 256>}]} {
    %c0 = arith.constant 0 : index
    %c0_0 = arith.constant 0 : index
    %0 = vector.load %arg3[%c0, %c0_0] : memref<8x4xf32, #tpu.memory_space<vmem>>, vector<8x4xf32>
    %c0_1 = arith.constant 0 : index
    %c0_2 = arith.constant 0 : index
    %1 = vector.load %arg4[%c0_1, %c0_2] : memref<8x1xf32, #tpu.memory_space<vmem>>, vector<8x1xf32>
    %c0_3 = arith.constant 0 : index
    %c0_4 = arith.constant 0 : index
    %c0_5 = arith.constant 0 : index
    %2 = vector.load %arg2[%c0_3, %c0_4, %c0_5] : memref<1x4x256xf32, #tpu.memory_space<vmem>>, vector<1x4x256xf32>
    %3 = vector.shape_cast %2 : vector<1x4x256xf32> to vector<4x256xf32>
    %cst = arith.constant dense<0.000000e+00> : vector<8x256xf32>
    %4 = tpu.matmul %0, %3, %cst {dimension_numbers = #tpu.dot_dimension_numbers<[1], [0], [0], [1], [0, 0, 1, 1], [], []>} : vector<8x4xf32>, vector<4x256xf32>, vector<8x256xf32> -> vector<8x256xf32>
    %5 = vector.broadcast %1 : vector<8x1xf32> to vector<8x256xf32>
    %6 = arith.addf %4, %5 : vector<8x256xf32>
    %7 = math.sin %6 : vector<8x256xf32>
    %c0_6 = arith.constant 0 : index
    %c0_7 = arith.constant 0 : index
    %c0_8 = arith.constant 0 : index
    %8 = vector.load %arg5[%c0_6, %c0_7, %c0_8] : memref<1x8x256xf32, #tpu.memory_space<vmem>>, vector<1x8x256xf32>
    %9 = vector.shape_cast %8 : vector<1x8x256xf32> to vector<8x256xf32>
    %10 = vector.shape_cast %7 : vector<8x256xf32> to vector<1x8x256xf32>
    tpu.vector_store %arg5[%c0_6, %c0_7, %c0_8], %10 {strides = array<i32>} : memref<1x8x256xf32, #tpu.memory_space<vmem>>, vector<1x8x256xf32>,
    return
  }
  func.func @transform_0(%arg0: i32, %arg1: i32) -> (i32, i32, i32) {
    %c0_i32 = arith.constant 0 : i32
    %c0_i32_0 = arith.constant 0 : i32
    return %arg0, %c0_i32, %arg1 : i32, i32, i32
  }
  func.func @transform_1(%arg0: i32, %arg1: i32) -> (i32, i32) {
    %c0_i32 = arith.constant 0 : i32
    %c0_i32_0 = arith.constant 0 : i32
    %c0_i32_1 = arith.constant 0 : i32
    return %c0_i32, %c0_i32_0 : i32, i32
  }
  func.func @transform_2(%arg0: i32, %arg1: i32) -> (i32, i32) {
    %c0_i32 = arith.constant 0 : i32
    %c0_i32_0 = arith.constant 0 : i32
    %c0_i32_1 = arith.constant 0 : i32
    return %c0_i32, %c0_i32_0 : i32, i32
  }
  func.func @transform_3(%arg0: i32, %arg1: i32) -> (i32, i32, i32) {
    %c0_i32 = arith.constant 0 : i32
    %c0_i32_0 = arith.constant 0 : i32
    return %arg0, %c0_i32, %arg1 : i32, i32, i32
  }
}

</mosaic_0001>

<bundles_post_ra>
// kernel: tpu_custom_call.1
= control target key start
LH: loop header
LB: loop body
LE: loop exit
PB: predicated region body
PF: predicated region fallthrough
CT: control target
= control target key end

     0   :  { %8 = vsyncpa [#allocation3], 0  ;;  %s1001_s0 = inlined_call_operand.vmem [shape: f32[2,4,256], index: 0, kind: input, shape index: {}]   ;;  %s1002_s1 = inlined_call_operand.vmem [shape: f32[8,4], index: 1, kind: input, shape index: {}]   ;;  %s1003_s2 = inlined_call_operand.vmem [shape: f32[8,1], index: 2, kind: input, shape index: {}]   ;;  %s1004_s3 = inlined_call_operand.hbm [shape: f32[2,8,256], index: 3, kind: output, shape index: {}]  }
   0x1   :  { %10 = vsyncpa [#allocation3 + $0x1], 0  ;;  %s809_s12 = smov 0   ;;  %s811_s13 = smov 0  }
   0x2   :  { %s813_s14 = smov 0   ;;  %s815_s15 = smov 0  }
   0x3   :  { %s817_s16 = smov 0   ;;  %s819_s17 = smov 0  }
   0x4 LB: > { %s593_s18 = sadd.s32 4294967295, %s778_s17   ;;  %s594_s19 = sadd.s32 4294967294, %s778_s17   ;;  %s778_s17 = sphi %s819_s17, %s16_s17   ;;  %s774_s16 = sphi %s817_s16, %s1013_s16   ;;  %s770_s15 = sphi %s815_s15, %s1012_s15   ;;  %s766_s14 = sphi %s813_s14, %s1011_s14   ;;  %s762_s13 = sphi %s811_s13, %s1010_s13   ;;  %s758_s12 = sphi %s809_s12, %s1009_s12  }
   0x5   : > { %s28_s20 = sadd.s32 1, %s774_s16  ;;  %s107_s21 = sadd.s32 1, %s766_s14 }
   0x6   : > { %p30_p0 = scmp.ge.s32.totalorder %s28_s20, 2  ;;  %p117_p1 = scmp.ne.s32.totalorder %s766_s14, %s762_s13 }
   0x7   : > { %p118_p2 = scmp.eq.s32.totalorder %s593_s18, 1  ;;  %p123_p3 = scmp.ne.s32.totalorder %s762_s13, %s758_s12 }
   0x8   : > { %s1015_s20 = smov (%p30_p0, %s28_s20), 0  ;;  %p124_p5 = scmp.eq.s32.totalorder %s594_s19, 1 }
   0x9   : > { %p849_p4 = por %p118_p2, %p117_p1  ;;  %s102_s23 = ssub.s32 %s774_s16, %s1015_s20 }
   0xa   : > { %p597_p6 = scmp.ge.s32.totalorder %s778_s17, 1  ;;  %p105_p7 = scmp.eq.s32.totalorder %s102_s23, 0 }
   0xb   : > { %p856_p8 = por %p124_p5, %p123_p3  ;;  %p161_p9 = scmp.lt.s32.totalorder %s778_s17, 3 }
   0xc   : > { %s862_s25 = scalar_select %p105_p7, %s766_s14, %s107_s21  }
   0xd   : > { %p162_p10 = pnand %p597_p6, %p161_p9 }
   0xe   : > { %p190_p11 = scmp.lt.s32.totalorder (!%p162_p10), %s770_s15, 1  ;;  %v780_v0 = vmov (!%p162_p10), 0.0   ;;  %v781_v1 = vmov (!%p162_p10), 0   ;;  %v201_v2 = vld [vmem:[%s1003_s2] sm:$0xff] (!%p162_p10)  ;;  %vm214_vm0 = vcmask (!%p162_p10), 1043456   ;;  %vm210_vm1 = vcmask (!%p162_p10), 31744  }
   0xf   : > { %165 = sbr.rel (%p162_p10) target bundleno = 348 (0x15c), region = 32  ;;  %283 = vmatprep.mubr.f32.mxu0 (!%p162_p10), %v780_v0  ;;  %690 = vset.pattern.permute.xlu0 (!%p162_p10), %v781_v1  ;;  %v200_v5 = vld [vmem:[%s1002_s1] sm:$0xff] (!%p162_p10)  ;;  %v782_v31 = vmov (!%p162_p10), 683565275   ;;  %v783_v35 = vmov (!%p162_p10), 2475754826  }
  0x10   : > { %205 = vperm.xlu0 (!%p162_p10), %690, %v201_v2   ;;  %v784_v37 = vmov (!%p162_p10), 2131351028   ;;  %v785_v39 = vmov (!%p162_p10), 2102212464   ;;  %v786_v41 = vmov (!%p162_p10), 920167782  }
  0x11   : > { %v787_v48 = vmov (!%p162_p10), 1326507024   ;;  %s186_s8 = sand.u32 (!%p162_p10), 1, %s762_s13   ;;  %s618_s11 = sshll.u32 (!%p162_p10), %s770_s15, 8 }
  0x12   : > { %s598_s9 = sshll.u32 (!%p162_p10), %s186_s8, 4  ;;  %s952_s23 = scalar_lea.hbm (!%p162_p10), %s1004_s3, %s618_s11 }
  0x13   : > { %s188_s10 = scalar_lea.vmem (!%p162_p10), [#allocation2], %s598_s9  ;;  %s788_s27 = smov (!%p162_p10), [#allocation2]  }
  0x14   : > { %s517_s18 = sshll.u32 (!%p162_p10), %s188_s10, 4  ;;  %s954_s18 = int_to_ptr.vmem [resolvable:$true] %s517_s18 }
  0x15   : > { %s700_s26 = scalar_lea.vmem (!%p162_p10), %s954_s18, 256 }
  0x16   : > { %s191_s28 = scalar_select %p190_p11, %s770_s15, 1 }
  0x17   : > { %s501_s15 = scalar_lea.sflag [#allocation3], %s186_s8  ;;  %p701_p12 = scmp.ne.s32.totalorder %s954_s18, %s700_s26 }
  0x18   : > { %s617_s29 = sshll.u32 %s191_s28, 3  ;;  %s704_s28 = sshll.u32 %s788_s27, 4  ;;  %s705_s28 = int_to_ptr.vmem [resolvable:$false] %s704_s28 }
  0x19   : > { %s197_s5 = scalar_lea.vmem %s1001_s0, %s617_s29  ;;  %p702_p13 = pnand %p701_p12, %p849_p4 }
  0x1a   : > { %v202_v3 = vld [vmem:[%s197_s5] sm:$0xff]  ;;  %s706_s29 = scalar_lea.vmem %s705_s28, 512  ;;  %p707_p1 = scmp.lt.s32.totalorder %s954_s18, %s705_s28 }
  0x1b   : > { %v209_v4 = vcombine.high %v202_v3, %v202_v3  ;;  %p703_p0 = pneg %p702_p13  ;;  %p708_p2 = scmp.lt.s32.totalorder %s706_s29, %s700_s26 }
  0x1d   : > { %601 = vmatprep.subr.msk.mxu0 %vm214_vm0, %v209_v4  ;;  %p709_p3 = por %p708_p2, %p707_p1 }
  0x1e   : > { %602 = vmatpush1.msk.msra.mxu0 %vm214_vm0, %v202_v3 }
  0x1f   : > { %603 = vmatmul.mubr.msk.f32.vlgmr.msra.gmra.mrb[0].mxu0 %vm210_vm1, %v200_v5  ;;  %p710_p5 = pnand %p709_p3, %p703_p0 }
  0x8f   : > { %v206_v6 = vpop.permute.xlu0 %205 }
  0xf2   : > { %v285_v7 = vpop.f32.mrb[0].mxu0 }
  0xf3   : > { %v875_v8 = vadd.f32 %v285_v7, %v206_v6  ;;  %v287_v9 = vpop.f32.mrb[1].mxu0 }
  0xf4   : > { %v877_v10 = vadd.f32 %v287_v9, %v206_v6 }
  0xf5   : > { %v290_v11 = vand.u32 2147483647, %v875_v8  ;;  %v293_v12 = vand.u32 2139095040, %v875_v8  ;;  %vm292_vm0 = vcmp.lt.s32.totalorder %v875_v8, 0 }
  0xf6   : > { %v397_v13 = vand.u32 2139095040, %v877_v10  ;;  %v394_v16 = vand.u32 2147483647, %v877_v10 }
  0xf7   : > { %v294_v14 = vshrl.u32 %v293_v12, 23  ;;  %v297_v15 = vand.u32 8388607, %v290_v11  ;;  %vm291_vm1 = vcmp.le.f32.partialorder %v290_v11, 0.7853982 }
  0xf8   : > { %v398_v17 = vshrl.u32 %v397_v13, 23  ;;  %v887_v22 = vand.u32 8388607, %v394_v16 }
  0xf9   : > { %v604_v18 = vadd.s32 4294967169, %v294_v14  ;;  %v298_v21 = vor.u32 8388608, %v297_v15 }
  0xfa   : > { %v608_v19 = vadd.s32 4294967169, %v398_v17  ;;  %v402_v29 = vor.u32 8388608, %v887_v22 }
  0xfb   : > { %v300_v20 = vadd.s32 1, %v604_v18  ;;  %v889_v28 = vshll.u32 %v298_v21, 8 }
  0xfc   : > { %v404_v23 = vadd.s32 1, %v608_v19 }
  0xfd   : > { %vm301_vm2 = vcmp.gt.s32.totalorder %v300_v20, 0 }
  0xfe   : > { %v302_v24 = vsel %vm301_vm2, %v300_v20, 0  ;;  %vm405_vm3 = vcmp.gt.s32.totalorder %v404_v23, 0  ;;  %vm396_vm2 = vcmp.lt.s32.totalorder %v877_v10, 0 }
  0xff   : > { %v303_v25 = vshrl.u32 %v302_v24, 5  ;;  %v304_v26 = vand.u32 31, %v302_v24  ;;  %v406_v27 = vsel %vm405_vm3, %v404_v23, 0  ;;  %v442_v23 = vshll.u32 %v402_v29, 8 }
 0x100   : > { %v892_v33 = vshrl.u32 %v406_v27, 5  ;;  %v408_v34 = vand.u32 31, %v406_v27  ;;  %vm934_vm3 = vcmp.le.f32.partialorder %v394_v16, 0.7853982 }
 0x101   : > { %v305_v30 = vsub.s32 32, %v304_v26  ;;  %v307_v32 = vshll.u32 %v782_v31, %v304_v26  ;;  %v310_v36 = vshll.u32 %v783_v35, %v304_v26  ;;  %v313_v38 = vshll.u32 %v784_v37, %v304_v26 }
 0x102   : > { %v316_v40 = vshll.u32 %v785_v39, %v304_v26  ;;  %v319_v42 = vshll.u32 %v786_v41, %v304_v26  ;;  %vm322_vm4 = vcmp.lt.s32.totalorder %v303_v25, 1  ;;  %vm323_vm5 = vcmp.lt.s32.totalorder %v303_v25, 2 }
 0x103   : > { %v308_v43 = vshrl.u32 %v783_v35, %v305_v30  ;;  %v311_v44 = vshrl.u32 %v784_v37, %v305_v30  ;;  %v314_v45 = vshrl.u32 %v785_v39, %v305_v30  ;;  %v306_v46 = vshrl.u32 %v782_v31, %v305_v30 }
 0x104   : > { %v317_v47 = vshrl.u32 %v786_v41, %v305_v30  ;;  %v320_v49 = vshrl.u32 %v787_v48, %v305_v30  ;;  %v409_v53 = vsub.s32 32, %v408_v34  ;;  %vm324_vm6 = vcmp.lt.s32.totalorder %v303_v25, 3 }
 0x105   : > { %v309_v50 = vor.u32 %v308_v43, %v307_v32  ;;  %v312_v51 = vor.u32 %v311_v44, %v310_v36  ;;  %v315_v52 = vor.u32 %v314_v45, %v313_v38  ;;  %vm325_vm7 = vcmp.lt.s32.totalorder %v303_v25, 4 }
 0x106   : > { %v318_v54 = vor.u32 %v317_v47, %v316_v40  ;;  %v321_v55 = vor.u32 %v320_v49, %v319_v42  ;;  %v411_v63 = vshll.u32 %v782_v31, %v408_v34  ;;  %v412_v2 = vshrl.u32 %v783_v35, %v409_v53 }
 0x107   : > { %v326_v56 = vsel %vm322_vm4, %v306_v46, %v309_v50  ;;  %v327_v57 = vsel %vm325_vm7, %v315_v52, 2102212464  ;;  %v330_v58 = vsel %vm322_vm4, %v309_v50, %v312_v51  ;;  %v334_v59 = vsel %vm322_vm4, %v312_v51, %v315_v52 }
 0x108   : > { %v328_v60 = vsel %vm324_vm6, %v312_v51, %v327_v57  ;;  %v331_v61 = vsel %vm325_vm7, %v318_v54, 920167782  ;;  %v335_v62 = vsel %vm325_vm7, %v321_v55, 1326507024  ;;  %v414_v3 = vshll.u32 %v783_v35, %v408_v34 }
 0x109   : > { %v332_v0 = vsel %vm324_vm6, %v315_v52, %v331_v61  ;;  %v336_v1 = vsel %vm324_vm6, %v318_v54, %v335_v62  ;;  %v329_v4 = vsel %vm323_vm5, %v326_v56, %v328_v60  ;;  %v415_v7 = vshrl.u32 %v784_v37, %v409_v53 }
 0x10a   : > { %v333_v5 = vsel %vm323_vm5, %v330_v58, %v332_v0  ;;  %v337_v6 = vsel %vm323_vm5, %v334_v59, %v336_v1  ;;  %v413_v15 = vor.u32 %v412_v2, %v411_v63  ;;  %v417_v18 = vshll.u32 %v784_v37, %v408_v34 }
 0x10b   : > { %v901_v9 = vmul.u32.u64.low %v889_v28, %v337_v6  ;;  %v902_v12 = vmul.u32.u64.high %v889_v28, %v337_v6, %v901_v9  ;;  %v905_v13 = vmul.u32.u64.low %v889_v28, %v333_v5  ;;  %v906_v14 = vmul.u32.u64.high %v889_v28, %v333_v5, %v905_v13 }
 0x10c   : > { %v416_v17 = vor.u32 %v415_v7, %v414_v3  ;;  %v418_v19 = vshrl.u32 %v785_v39, %v409_v53  ;;  %v420_v20 = vshll.u32 %v785_v39, %v408_v34  ;;  %v421_v21 = vshrl.u32 %v786_v41, %v409_v53 }
 0x10d   : > { %v424_v22 = vshrl.u32 %v787_v48, %v409_v53  ;;  %v345_v24 = vmul.u32 %v889_v28, %v329_v4  ;;  %v410_v25 = vshrl.u32 %v782_v31, %v409_v53  ;;  %v423_v27 = vshll.u32 %v786_v41, %v408_v34 }
 0x10e   : > { %v419_v26 = vor.u32 %v418_v19, %v417_v18  ;;  %vm347_vm8 = vc.u32 %v902_v12, %v905_v13  ;;  %v348_v30 = vadd.s32 1, %v906_v14  ;;  %v422_v32 = vor.u32 %v421_v21, %v420_v20 }
 0x10f   : > { %vm426_vm9 = vcmp.lt.s32.totalorder %v892_v33, 1  ;;  %v425_v35 = vor.u32 %v424_v22, %v423_v27  ;;  %vm428_vm10 = vcmp.lt.s32.totalorder %v892_v33, 3  ;;  %vm429_vm11 = vcmp.lt.s32.totalorder %v892_v33, 4 }
 0x110   : > { %v434_v36 = vsel %vm426_vm9, %v413_v15, %v416_v17  ;;  %v349_v29 = vsel %vm347_vm8, %v348_v30, %v906_v14  ;;  %v431_v37 = vsel %vm429_vm11, %v419_v26, 2102212464  ;;  %v435_v28 = vsel %vm429_vm11, %v422_v32, 920167782 }
 0x111   : > { %v438_v31 = vsel %vm426_vm9, %v416_v17, %v419_v26  ;;  %v350_v38 = vadd.s32 %v349_v29, %v345_v24  ;;  %vm427_vm12 = vcmp.lt.s32.totalorder %v892_v33, 2  ;;  %v436_v34 = vsel %vm428_vm10, %v419_v26, %v435_v28 }
 0x112   : > { %v439_v39 = vsel %vm429_vm11, %v425_v35, 1326507024  ;;  %v430_v40 = vsel %vm426_vm9, %v410_v25, %v413_v15  ;;  %v432_v41 = vsel %vm428_vm10, %v416_v17, %v431_v37  ;;  %v437_v42 = vsel %vm427_vm12, %v434_v36, %v436_v34 }
 0x113   : > { %v440_v43 = vsel %vm428_vm10, %v422_v32, %v439_v39  ;;  %v351_v44 = vadd.s32 536870912, %v350_v38  ;;  %v916_v46 = vmul.u32.u64.low %v442_v23, %v437_v42  ;;  %v917_v47 = vmul.u32.u64.high %v442_v23, %v437_v42, %v916_v46 }
 0x114   : > { %v441_v45 = vsel %vm427_vm12, %v438_v31, %v440_v43  ;;  %v433_v51 = vsel %vm427_vm12, %v430_v40, %v432_v41  ;;  %v346_v3 = vadd.s32 %v905_v13, %v902_v12  ;;  %vm382_vm7 = vweird.f32 %v875_v8 }
 0x115   : > { %v919_v48 = vmul.u32.u64.low %v442_v23, %v441_v45  ;;  %v920_v49 = vmul.u32.u64.high %v442_v23, %v441_v45, %v919_v48  ;;  %v352_v50 = vshrl.u32 %v351_v44, 30  ;;  %v452_v53 = vadd.s32 1, %v917_v47 }
 0x116   : > { %v449_v33 = vmul.u32 %v442_v23, %v433_v51  ;;  %vm486_vm11 = vweird.f32 %v877_v10 }
 0x117   : > { %v353_v52 = vshll.u32 %v352_v50, 30  ;;  %vm451_vm13 = vc.u32 %v920_v49, %v916_v46  ;;  %v450_v24 = vadd.s32 %v916_v46, %v920_v49  ;;  %v376_v13 = vsub.s32 4, %v352_v50 }
 0x118   : > { %v453_v55 = vsel %vm451_vm13, %v452_v53, %v917_v47 }
 0x119   : > { %v354_v54 = vsub.s32 %v350_v38, %v353_v52  ;;  %v454_v56 = vadd.s32 %v453_v55, %v449_v33  ;;  %v377_v28 = vsel %vm292_vm0, %v376_v13, %v352_v50 }
 0x11a   : > { %v379_v40 = vsel %vm291_vm1, 0, %v377_v28 }
 0x11b   : > { %v356_v57 = vsub.s32 0, %v354_v54  ;;  %v455_v58 = vadd.s32 536870912, %v454_v56  ;;  %v383_v43 = vadd.s32 3, %v379_v40 }
 0x11d   : > { %v605_v59 = vmin.u32 %v356_v57, %v354_v54  ;;  %v456_v60 = vshrl.u32 %v455_v58, 30  ;;  %v384_v48 = vand.u32 3, %v383_v43 }
 0x11f   : > { %v358_v61 = vclz %v605_v59  ;;  %v457_v62 = vshll.u32 %v456_v60, 30  ;;  %v480_v42 = vsub.s32 4, %v456_v60  ;;  %vm389_vm4 = vcmp.eq.s32.totalorder %v384_v48, 2 }
 0x120   : > { %vm386_vm5 = vcmp.eq.s32.totalorder %v384_v48, 0  ;;  %vm385_vm6 = vcmp.lt.s32.totalorder %v384_v48, 2 }
 0x121   : > { %v606_v63 = vadd.s32 4294967294, %v358_v61  ;;  %v458_v0 = vsub.s32 %v454_v56, %v457_v62  ;;  %v481_v46 = vsel %vm396_vm2, %v480_v42, %v456_v60 }
 0x122   : > { %v483_v50 = vsel %vm934_vm3, 0, %v481_v46 }
 0x123   : > { %vm607_vm14 = vcmp.lt.s32.totalorder %v606_v63, 0  ;;  %v460_v2 = vsub.s32 0, %v458_v0  ;;  %v487_v33 = vadd.s32 3, %v483_v50 }
 0x124   : > { %v361_v1 = vsel %vm607_vm14, 0, %v606_v63 }
 0x125   : > { %v362_v4 = vsub.s32 32, %v361_v1  ;;  %v366_v5 = vsub.s32 4294967266, %v361_v1  ;;  %v609_v6 = vmin.u32 %v460_v2, %v458_v0  ;;  %v363_v7 = vshll.u32 %v354_v54, %v361_v1 }
 0x126   : > { %v488_v57 = vand.u32 3, %v487_v33 }
 0x127   : > { %v364_v9 = vshrl.u32 %v346_v3, %v362_v4  ;;  %v367_v14 = vadd.s32 127, %v366_v5  ;;  %v462_v15 = vclz %v609_v6 }
 0x128   : > { %vm493_vm8 = vcmp.eq.s32.totalorder %v488_v57, 2  ;;  %vm490_vm9 = vcmp.eq.s32.totalorder %v488_v57, 0  ;;  %vm489_vm10 = vcmp.lt.s32.totalorder %v488_v57, 2 }
 0x129   : > { %v365_v17 = vor.u32 %v364_v9, %v363_v7  ;;  %v368_v18 = vshll.u32 %v367_v14, 23  ;;  %v610_v19 = vadd.s32 4294967294, %v462_v15 }
 0x12b   : > { %v369_v20 = vor.u32 4788187, %v368_v18  ;;  %vm611_vm15 = vcmp.lt.s32.totalorder %v610_v19, 0  ;;  %v372_v22 = vcvt.s32.f32 %v365_v17 }
 0x12c   : > { %v465_v23 = vsel %vm611_vm15, 0, %v610_v19 }
 0x12d   : > { %v370_v21 = vand.u32 2147483647, %v369_v20  ;;  %v466_v25 = vsub.s32 32, %v465_v23  ;;  %v470_v26 = vsub.s32 4294967266, %v465_v23  ;;  %v467_v27 = vshll.u32 %v458_v0, %v465_v23 }
 0x12f   : > { %v373_v12 = vmul.f32 %v372_v22, %v370_v21  ;;  %v468_v30 = vshrl.u32 %v450_v24, %v466_v25  ;;  %v471_v32 = vadd.s32 127, %v470_v26 }
 0x131   : > { %v374_v35 = vxor.u32 2147483648, %v373_v12  ;;  %v469_v36 = vor.u32 %v468_v30, %v467_v27  ;;  %v472_v29 = vshll.u32 %v471_v32, 23 }
 0x133   : > { %v375_v37 = vsel %vm292_vm0, %v374_v35, %v373_v12  ;;  %v473_v38 = vor.u32 4788187, %v472_v29  ;;  %v476_v39 = vcvt.s32.f32 %v469_v36 }
 0x134   : > { %v378_v31 = vsel %vm291_vm1, %v875_v8, %v375_v37 }
 0x135   : > { %692 = vcosq.f32 %v378_v31  ;;  %v474_v34 = vand.u32 2147483647, %v473_v38 }
 0x136   : > { %694 = vsinq.f32 %v378_v31 }
 0x137   : > { %v477_v41 = vmul.f32 %v476_v39, %v474_v34 }
 0x139   : > { %v478_v44 = vxor.u32 2147483648, %v477_v41 }
 0x13b   : > { %v479_v45 = vsel %vm396_vm2, %v478_v44, %v477_v41 }
 0x13c   : > { %v482_v47 = vsel %vm934_vm3, %v877_v10, %v479_v45 }
 0x13d   : > { %696 = vcosq.f32 %v482_v47 }
 0x13e   : > { %698 = vsinq.f32 %v482_v47 }
 0x13f   : > { %v693_v49 = vpop.eup %692 }
 0x140   : > { %v695_v51 = vpop.eup %694  ;;  %v390_v16 = vxor.u32 2147483648, %v693_v49 }
 0x141   : > { %v387_v52 = vxor.u32 2147483648, %v695_v51 }
 0x142   : > { %v391_v53 = vsel %vm389_vm4, %v390_v16, %v695_v51 }
 0x143   : > { %v388_v54 = vsel %vm386_vm5, %v693_v49, %v387_v52 }
 0x144   : > { %v392_v55 = vsel %vm385_vm6, %v388_v54, %v391_v53 }
 0x145   : > { %v393_v56 = vsel %vm382_vm7, nan, %v392_v55 }
 0x146   : > { %498 = vst [vmem:[%s188_s10] sm:$0xff] %v393_v56 }
 0x147   : > { %v697_v58 = vpop.eup %696 }
 0x148   : > { %v699_v59 = vpop.eup %698  ;;  %v494_v60 = vxor.u32 2147483648, %v697_v58 }
 0x149   : > { %v491_v61 = vxor.u32 2147483648, %v699_v59 }
 0x14a   : > { %v495_v62 = vsel %vm493_vm8, %v494_v60, %v699_v59 }
 0x14b   : > { %v492_v63 = vsel %vm490_vm9, %v697_v58, %v491_v61 }
 0x14c   : > { %v496_v8 = vsel %vm489_vm10, %v492_v63, %v495_v62 }
 0x14d   : > { %v497_v0 = vsel %vm486_vm11, nan, %v496_v8 }
 0x14e   : > { %499 = vst [vmem:[%s188_s10 + $0x8] sm:$0xff] %v497_v0 }
 0x14f   : > { %713 = shalt.err (!%p710_p5)
}
 0x150   : > { %s714_s30 = scalar_lea.hbm %s952_s23, 256  ;;  %s718_s6 = scalar_lea.hbm %s1004_s3, 512 }
 0x151   : > { %p715_p6 = scmp.ne.s32.totalorder %s952_s23, %s714_s30  ;;  %p719_p10 = scmp.lt.u32.totalorder %s952_s23, %s1004_s3 }
 0x152   : > { %p720_p11 = scmp.lt.u32.totalorder %s718_s6, %s714_s30  ;;  %p722_p13 = scmp.lt.u32.totalorder %s714_s30, %s952_s23 }
 0x153   : > { %p716_p7 = pnand %p715_p6, %p849_p4 }
 0x154   : > { %p721_p12 = por %p720_p11, %p719_p10 }
 0x155   : > { %p717_p9 = pneg %p716_p7 }
 0x156   : > { %p723_p0 = por %p722_p13, %p721_p12 }
 0x158   : > { %p724_p1 = pnand %p723_p0, %p717_p9 }
 0x15a   : > { %727 = shalt.err (!%p724_p1)
}
 0x15b   : > { %627 = dma.vmem_to_hbm [thread:$0]  (%p849_p4), %s954_s18, 256, %s952_s23, %s501_s15  }
 0x15c PF: > { %p633_p2 = scmp.ge.s32.totalorder %s778_s17, 2  ;;  %s529_s9 = sand.u32 1, %s758_s12  }
 0x15d   : > { %s530_s10 = scalar_lea.sflag [#allocation3], %s529_s9 }
 0x15e   : > { %p630_p3 = pnand %p633_p2, %p856_p8 }
 0x160   : > { %753 = dma.done.wait (!%p630_p3), %s530_s10, 256  }
 0x161   : > { %755 = vsyncadd (!%p630_p3), %s530_s10, 4294967040  ;;  %s16_s17 = sadd.s32 1, %s778_s17   ;;  %s1009_s12 = smov %s762_s13 }
 0x162   : > { %p13_p5 = scmp.ge.s32.totalorder %s16_s17, 4   ;;  %s1010_s13 = smov %s766_s14 }
 0x163   : > { %s1011_s14 = smov %s862_s25  ;;  %s1012_s15 = smov %s774_s16 }
 0x164   : > { %s1013_s16 = smov %s1015_s20  ;;  %15 = sbr.rel (!%p13_p5) target bundleno = 4 (0x4), region = 67 }
 0x16b   :  { %535 = vsyncpa [#allocation3], 1 }
 0x16c   :  { %537 = vsyncpa [#allocation3 + $0x1], 1 }

</bundles_post_ra>
